<compile_context>
chip_gen: v6e
topology: v6e:2x2x1
jax: 0.10.0
libtpu: 0.0.40
codegen_flags: <defaults>
</compile_context>

<pallas_src>
import numpy as np
import jax
import jax.numpy as jnp
from jax import lax
from jax.experimental import pallas as pl
from jax.experimental.pallas import tpu as pltpu


def _make_fused_kernel(n_way, n_support, n_query, n_rows, d_out, e_blk):
    """Fused backbone + parse_feature + ProtoNet scores for E_blk episodes."""
    nq_tot = n_way * n_query
    inv_s = 1.0 / float(n_support)

    def kernel(x_ref, w_ref, sup_ref, qry_ref, o_ref):
        # x_ref  : [e_blk*n_rows, d_in]   f32   (E_blk episodes stacked along M)
        # w_ref  : [d_in, d_out]          bf16  (VMEM-resident across steps)
        # sup_ref: [n_way,  n_rows]       f32   (shared per-episode support mask)
        # qry_ref: [nq_tot, n_rows]       f32   (shared per-episode query mask)
        # o_ref  : [e_blk, nq_tot, n_way] f32
        #
        # Backbone: one big MXU matmul over all episodes in the block. The bf16
        # cast of x happens here (VPU work hidden under MXU/DMA slack) so the
        # wrapper does not pay an extra HBM pass. Bias is omitted: it cancels
        # exactly inside -||z_q - proto||^2 (provably dead work for the scores).
        z = jnp.dot(x_ref[...].astype(jnp.bfloat16), w_ref[...],
                    preferred_element_type=jnp.float32)       # [e_blk*n_rows, d]

        sup_mask = sup_ref[...]
        qry_mask = qry_ref[...]
        ones_row = jnp.ones((1, d_out), jnp.float32)          # built once per step

        # Short unrolled loop over the episodes of this block (linear cost,
        # shared masks). For very large e_blk switch to lax.fori_loop(unroll=k)
        # to bound trace size / live ranges.
        for ep in range(e_blk):
            z_ep = z[ep * n_rows:(ep + 1) * n_rows, :]        # [n_rows, d]
            proto_sum = jnp.dot(sup_mask, z_ep,
                                preferred_element_type=jnp.float32)  # [n_way, d]
            zq = jnp.dot(qry_mask, z_ep,
                         preferred_element_type=jnp.float32)         # [nq_tot, d]

            # -||q - proto||^2 with the 1/n_support mean folded into scalar
            # scales. p_sq via a 1xD ones matmul keeps it lane-oriented (no
            # [n_way,1] -> [1,n_way] transpose). Expanded form is f32; fine at
            # these magnitudes (diff-form only needed if features get huge).
            cross = lax.dot_general(zq, proto_sum, (((1,), (1,)), ((), ())),
                                    preferred_element_type=jnp.float32)  # [nq_tot, n_way]
            q_sq = jnp.sum(zq * zq, axis=-1, keepdims=True)                # [nq_tot, 1]
            p_sq = lax.dot_general(ones_row, proto_sum * proto_sum,
                                   (((1,), (1,)), ((), ())),
                                   preferred_element_type=jnp.float32)     # [1, n_way]
            o_ref[ep, :, :] = -(q_sq - (2.0 * inv_s) * cross
                                + (inv_s * inv_s) * p_sq)

    return kernel


class MetaTemplatePallas:
    """Mirrors MetaTemplate's attributes; forward = fused episodic head."""

    def __init__(self, n_way, n_support, n_query, d_in=128, d_out=128, seed=0):
        self.n_way = n_way
        self.n_support = n_support
        self.n_query = n_query
        self.d_in = d_in
        self.d_out = d_out
        per = n_support + n_query
        self.n_rows = n_way * per
        self.nq_tot = n_way * n_query
        # bf16 backbone weights: halve weight HBM/VMEM traffic, feed the bf16
        # MXU; accumulation stays f32 via preferred_element_type.
        self.w = (jax.random.normal(jax.random.PRNGKey(seed),
                                    (d_in, d_out), jnp.float32)
                  * 0.05).astype(jnp.bfloat16)
        # Shared per-episode selection masks, built ONCE here (not per grid
        # step on the VPU) and fed to the kernel as tiny VMEM-resident inputs.
        r = np.arange(self.n_rows)
        sup = ((r[None, :] // per == np.arange(n_way)[:, None])
               & (r[None, :] % per < n_support)).astype(np.float32)
        q_rows = ((np.arange(self.nq_tot) // n_query) * per + n_support
                  + (np.arange(self.nq_tot) % n_query))
        qry = np.zeros((self.nq_tot, self.n_rows), np.float32)
        qry[np.arange(self.nq_tot), q_rows] = 1.0
        self.sup_mask = jnp.asarray(sup)       # [n_way,  n_rows]
        self.qry_mask = jnp.asarray(qry)       # [nq_tot, n_rows]
        # NOTE: no bias parameter -- a bias cancels exactly in -||z_q - proto||^2.

    def forward(self, x, e_blk=4):
        """x: [E, N, d_in] or [N, d_in] with N = n_way*(n_support+n_query), f32."""
        squeeze = x.ndim == 2
        if squeeze:
            x = x[None]
        e, n_rows, d_in = x.shape
        assert n_rows == self.n_rows and d_in == self.d_in

        # Episode block: big enough to fill the MXU M dim and amortize the
        # per-step cost, sublane-legal (e_blk*n_rows % 8 == 0), and leaving
        # >= 2 grid steps when possible so v7x's two TensorCores both get work.
        # (Production-scale e_blk ~64-256 fits comfortably under v7x's 32 MiB
        # default scoped VMEM; bump vmem_limit_bytes only if pushing further.)
        e_blk = max(1, min(e_blk, e))
        while (e_blk * n_rows) % 8 != 0 and e_blk < e:
            e_blk += 1
        if (e_blk * n_rows) % 8 != 0:
            e_blk = e            # single block == full array shape: exempt
        e_pad = -(-e // e_blk) * e_blk
        if e_pad != e:
            x = jnp.concatenate(
                [x, jnp.zeros((e_pad - e, n_rows, d_in), x.dtype)], axis=0)

        # Free contiguous reshape: episodes stacked along the matmul M dim.
        # NOTE: no astype here -- the bf16 cast happens inside the kernel.
        x2d = x.reshape(e_pad * n_rows, d_in)
        m_blk = e_blk * n_rows

        kernel = _make_fused_kernel(self.n_way, self.n_support, self.n_query,
                                    n_rows, self.d_out, e_blk)
        out = pl.pallas_call(
            kernel,
            out_shape=jax.ShapeDtypeStruct((e_pad, self.nq_tot, self.n_way),
                                           jnp.float32),
            grid=(e_pad // e_blk,),
            in_specs=[
                # E_blk episodes of x per grid step (f32; cast in-kernel).
                pl.BlockSpec((m_blk, d_in), lambda i: (i, 0)),
                # Weights + masks: constant index_map -> VMEM-resident blocks.
                pl.BlockSpec((d_in, self.d_out), lambda i: (0, 0)),
                pl.BlockSpec((self.n_way, n_rows), lambda i: (0, 0)),
                pl.BlockSpec((self.nq_tot, n_rows), lambda i: (0, 0)),
            ],
            out_specs=pl.BlockSpec((e_blk, self.nq_tot, self.n_way),
                                   lambda i: (i, 0, 0)),
            compiler_params=pltpu.CompilerParams(
                # Episode blocks are independent -> shard across TCs (v7x).
                dimension_semantics=("parallel",)),
        )(x2d, self.w, self.sup_mask, self.qry_mask)
        # TODO(synk): output last dim = n_way < 128 -> masked partial stores;
        # writeback is ~2% of total HBM traffic here, so the lane-dense
        # (episodes-along-lanes) layout is only worth plumbing at production scale.
        out = out[:e]
        return out[0] if squeeze else out


def _reference(model, x):
    """Plain-JAX reference (same bf16-matmul / f32-accumulate numerics)."""
    if x.ndim == 2:
        x = x[None]
    z = jnp.einsum("end,dh->enh", x.astype(jnp.bfloat16), model.w,
                   preferred_element_type=jnp.float32)
    e = z.shape[0]
    per = model.n_support + model.n_query
    z = z.reshape(e, model.n_way, per, model.d_out)
    zs = z[:, :, :model.n_support, :]
    zq = z[:, :, model.n_support:, :].reshape(
        e, model.n_way * model.n_query, model.d_out)
    proto = zs.mean(axis=2)
    diff = zq[:, :, None, :] - proto[:, None, :, :]
    return -jnp.sum(diff * diff, axis=-1)


if __name__ == "__main__":
    n_way, n_support, n_query = 4, 2, 3
    d_in = d_out = 128          # K = 128 fills the MXU contraction dimension
    n_episodes = 8              # 8 episodes, e_blk=4 -> grid=(2,) parallel steps

    model = MetaTemplatePallas(n_way, n_support, n_query,
                               d_in=d_in, d_out=d_out, seed=0)

    key = jax.random.PRNGKey(0)
    x = jax.random.normal(
        key, (n_episodes, n_way * (n_support + n_query), d_in), jnp.float32)

    scores = jax.block_until_ready(model.forward(x, e_blk=4))
    ref = _reference(model, x)

    assert scores.shape == (n_episodes, n_way * n_query, n_way)
    assert jnp.allclose(scores, ref, atol=1e-2, rtol=1e-2), (
        float(jnp.max(jnp.abs(scores - ref))))
    print("KERNEL_OK")
</pallas_src>

<mosaic_0001>
module attributes {stable_mosaic.version = 11 : i64} {
  func.func @kernel(%arg0: i32, %arg1: memref<80x128xf32, #tpu.memory_space<vmem>>, %arg2: memref<128x128xbf16, #tpu.memory_space<vmem>>, %arg3: memref<4x20xf32, #tpu.memory_space<vmem>>, %arg4: memref<12x20xf32, #tpu.memory_space<vmem>>, %arg5: memref<4x12x4xf32, #tpu.memory_space<vmem>>) attributes {dimension_semantics = [#tpu.dimension_semantics<parallel>], iteration_bounds = array<i64: 2>, scalar_prefetch = 0 : i64, scratch_operands = 0 : i64, tpu.core_type = #tpu.core_type<tc>, window_params = [{transform_indices = @transform_0, window_bounds = array<i64: 80, 128>}, {pipeline_mode = #tpu.pipeline_mode<synchronous>, transform_indices = @transform_1, window_bounds = array<i64: 128, 128>}, {pipeline_mode = #tpu.pipeline_mode<synchronous>, transform_indices = @transform_2, window_bounds = array<i64: 4, 20>}, {pipeline_mode = #tpu.pipeline_mode<synchronous>, transform_indices = @transform_3, window_bounds = array<i64: 12, 20>}, {transform_indices = @transform_4, window_bounds = array<i64: 4, 12, 4>}]} {
    %c0 = arith.constant 0 : index
    %c0_0 = arith.constant 0 : index
    %0 = vector.load %arg1[%c0, %c0_0] : memref<80x128xf32, #tpu.memory_space<vmem>>, vector<80x128xf32>
    %1 = arith.truncf %0 : vector<80x128xf32> to vector<80x128xbf16>
    %c0_1 = arith.constant 0 : index
    %c0_2 = arith.constant 0 : index
    %2 = vector.load %arg2[%c0_1, %c0_2] : memref<128x128xbf16, #tpu.memory_space<vmem>>, vector<128x128xbf16>
    %cst = arith.constant dense<0.000000e+00> : vector<80x128xf32>
    %3 = tpu.matmul %1, %2, %cst {dimension_numbers = #tpu.dot_dimension_numbers<[1], [0], [0], [1], [0, 0, 1, 1], [], []>} : vector<80x128xbf16>, vector<128x128xbf16>, vector<80x128xf32> -> vector<80x128xf32>
    %c0_3 = arith.constant 0 : index
    %c0_4 = arith.constant 0 : index
    %4 = vector.load %arg3[%c0_3, %c0_4] : memref<4x20xf32, #tpu.memory_space<vmem>>, vector<4x20xf32>
    %c0_5 = arith.constant 0 : index
    %c0_6 = arith.constant 0 : index
    %5 = vector.load %arg4[%c0_5, %c0_6] : memref<12x20xf32, #tpu.memory_space<vmem>>, vector<12x20xf32>
    %cst_7 = arith.constant 1.000000e+00 : f32
    %6 = vector.broadcast %cst_7 : f32 to vector<1x128xf32>
    %7 = vector.extract_strided_slice %3 {offsets = [0, 0], sizes = [20, 128], strides = [1, 1]} : vector<80x128xf32> to vector<20x128xf32>
    %cst_8 = arith.constant dense<0.000000e+00> : vector<4x128xf32>
    %8 = tpu.matmul %4, %7, %cst_8 {dimension_numbers = #tpu.dot_dimension_numbers<[1], [0], [0], [1], [0, 0, 1, 1], [], []>} : vector<4x20xf32>, vector<20x128xf32>, vector<4x128xf32> -> vector<4x128xf32>
    %cst_9 = arith.constant dense<0.000000e+00> : vector<12x128xf32>
    %9 = tpu.matmul %5, %7, %cst_9 {dimension_numbers = #tpu.dot_dimension_numbers<[1], [0], [0], [1], [0, 0, 1, 1], [], []>} : vector<12x20xf32>, vector<20x128xf32>, vector<12x128xf32> -> vector<12x128xf32>
    %cst_10 = arith.constant dense<0.000000e+00> : vector<12x4xf32>
    %10 = tpu.matmul %9, %8, %cst_10 {dimension_numbers = #tpu.dot_dimension_numbers<[1], [1], [0], [0], [0, 0, 1, 0], [], []>} : vector<12x128xf32>, vector<4x128xf32>, vector<12x4xf32> -> vector<12x4xf32>
    %11 = arith.mulf %9, %9 : vector<12x128xf32>
    %cst_11 = arith.constant dense<0.000000e+00> : vector<12xf32>
    %12 = vector.multi_reduction <add>, %11, %cst_11 [1] : vector<12x128xf32> to vector<12xf32>
    %13 = vector.shape_cast %12 : vector<12xf32> to vector<12x1xf32>
    %14 = arith.mulf %8, %8 : vector<4x128xf32>
    %cst_12 = arith.constant dense<0.000000e+00> : vector<1x4xf32>
    %15 = tpu.matmul %6, %14, %cst_12 {dimension_numbers = #tpu.dot_dimension_numbers<[1], [1], [0], [0], [0, 0, 1, 0], [], []>} : vector<1x128xf32>, vector<4x128xf32>, vector<1x4xf32> -> vector<1x4xf32>
    %cst_13 = arith.constant 1.000000e+00 : f32
    %16 = vector.broadcast %cst_13 : f32 to vector<12x4xf32>
    %17 = arith.mulf %16, %10 : vector<12x4xf32>
    %18 = vector.broadcast %13 : vector<12x1xf32> to vector<12x4xf32>
    %19 = arith.subf %18, %17 : vector<12x4xf32>
    %cst_14 = arith.constant 2.500000e-01 : f32
    %20 = vector.broadcast %cst_14 : f32 to vector<1x4xf32>
    %21 = arith.mulf %20, %15 : vector<1x4xf32>
    %22 = vector.broadcast %21 : vector<1x4xf32> to vector<12x4xf32>
    %23 = arith.addf %19, %22 : vector<12x4xf32>
    %cst_15 = arith.constant 0.000000e+00 : f32
    %24 = vector.broadcast %cst_15 : f32 to vector<12x4xf32>
    %25 = arith.subf %24, %23 : vector<12x4xf32>
    %c0_16 = arith.constant 0 : index
    %c0_17 = arith.constant 0 : index
    %c0_18 = arith.constant 0 : index
    %26 = vector.load %arg5[%c0_16, %c0_17, %c0_18] : memref<4x12x4xf32, #tpu.memory_space<vmem>>, vector<1x12x4xf32>
    %27 = vector.shape_cast %26 : vector<1x12x4xf32> to vector<12x4xf32>
    %28 = vector.shape_cast %25 : vector<12x4xf32> to vector<1x12x4xf32>
    tpu.vector_store %arg5[%c0_16, %c0_17, %c0_18], %28 {strides = array<i32>} : memref<4x12x4xf32, #tpu.memory_space<vmem>>, vector<1x12x4xf32>,
    %29 = vector.extract_strided_slice %3 {offsets = [20, 0], sizes = [20, 128], strides = [1, 1]} : vector<80x128xf32> to vector<20x128xf32>
    %cst_19 = arith.constant dense<0.000000e+00> : vector<4x128xf32>
    %30 = tpu.matmul %4, %29, %cst_19 {dimension_numbers = #tpu.dot_dimension_numbers<[1], [0], [0], [1], [0, 0, 1, 1], [], []>} : vector<4x20xf32>, vector<20x128xf32>, vector<4x128xf32> -> vector<4x128xf32>
    %cst_20 = arith.constant dense<0.000000e+00> : vector<12x128xf32>
    %31 = tpu.matmul %5, %29, %cst_20 {dimension_numbers = #tpu.dot_dimension_numbers<[1], [0], [0], [1], [0, 0, 1, 1], [], []>} : vector<12x20xf32>, vector<20x128xf32>, vector<12x128xf32> -> vector<12x128xf32>
    %cst_21 = arith.constant dense<0.000000e+00> : vector<12x4xf32>
    %32 = tpu.matmul %31, %30, %cst_21 {dimension_numbers = #tpu.dot_dimension_numbers<[1], [1], [0], [0], [0, 0, 1, 0], [], []>} : vector<12x128xf32>, vector<4x128xf32>, vector<12x4xf32> -> vector<12x4xf32>
    %33 = arith.mulf %31, %31 : vector<12x128xf32>
    %cst_22 = arith.constant dense<0.000000e+00> : vector<12xf32>
    %34 = vector.multi_reduction <add>, %33, %cst_22 [1] : vector<12x128xf32> to vector<12xf32>
    %35 = vector.shape_cast %34 : vector<12xf32> to vector<12x1xf32>
    %36 = arith.mulf %30, %30 : vector<4x128xf32>
    %cst_23 = arith.constant dense<0.000000e+00> : vector<1x4xf32>
    %37 = tpu.matmul %6, %36, %cst_23 {dimension_numbers = #tpu.dot_dimension_numbers<[1], [1], [0], [0], [0, 0, 1, 0], [], []>} : vector<1x128xf32>, vector<4x128xf32>, vector<1x4xf32> -> vector<1x4xf32>
    %cst_24 = arith.constant 1.000000e+00 : f32
    %38 = vector.broadcast %cst_24 : f32 to vector<12x4xf32>
    %39 = arith.mulf %38, %32 : vector<12x4xf32>
    %40 = vector.broadcast %35 : vector<12x1xf32> to vector<12x4xf32>
    %41 = arith.subf %40, %39 : vector<12x4xf32>
    %cst_25 = arith.constant 2.500000e-01 : f32
    %42 = vector.broadcast %cst_25 : f32 to vector<1x4xf32>
    %43 = arith.mulf %42, %37 : vector<1x4xf32>
    %44 = vector.broadcast %43 : vector<1x4xf32> to vector<12x4xf32>
    %45 = arith.addf %41, %44 : vector<12x4xf32>
    %cst_26 = arith.constant 0.000000e+00 : f32
    %46 = vector.broadcast %cst_26 : f32 to vector<12x4xf32>
    %47 = arith.subf %46, %45 : vector<12x4xf32>
    %c1 = arith.constant 1 : index
    %c0_27 = arith.constant 0 : index
    %c0_28 = arith.constant 0 : index
    %48 = vector.load %arg5[%c1, %c0_27, %c0_28] : memref<4x12x4xf32, #tpu.memory_space<vmem>>, vector<1x12x4xf32>
    %49 = vector.shape_cast %48 : vector<1x12x4xf32> to vector<12x4xf32>
    %50 = vector.shape_cast %47 : vector<12x4xf32> to vector<1x12x4xf32>
    tpu.vector_store %arg5[%c1, %c0_27, %c0_28], %50 {strides = array<i32>} : memref<4x12x4xf32, #tpu.memory_space<vmem>>, vector<1x12x4xf32>,
    %51 = vector.extract_strided_slice %3 {offsets = [40, 0], sizes = [20, 128], strides = [1, 1]} : vector<80x128xf32> to vector<20x128xf32>
    %cst_29 = arith.constant dense<0.000000e+00> : vector<4x128xf32>
    %52 = tpu.matmul %4, %51, %cst_29 {dimension_numbers = #tpu.dot_dimension_numbers<[1], [0], [0], [1], [0, 0, 1, 1], [], []>} : vector<4x20xf32>, vector<20x128xf32>, vector<4x128xf32> -> vector<4x128xf32>
    %cst_30 = arith.constant dense<0.000000e+00> : vector<12x128xf32>
    %53 = tpu.matmul %5, %51, %cst_30 {dimension_numbers = #tpu.dot_dimension_numbers<[1], [0], [0], [1], [0, 0, 1, 1], [], []>} : vector<12x20xf32>, vector<20x128xf32>, vector<12x128xf32> -> vector<12x128xf32>
    %cst_31 = arith.constant dense<0.000000e+00> : vector<12x4xf32>
    %54 = tpu.matmul %53, %52, %cst_31 {dimension_numbers = #tpu.dot_dimension_numbers<[1], [1], [0], [0], [0, 0, 1, 0], [], []>} : vector<12x128xf32>, vector<4x128xf32>, vector<12x4xf32> -> vector<12x4xf32>
    %55 = arith.mulf %53, %53 : vector<12x128xf32>
    %cst_32 = arith.constant dense<0.000000e+00> : vector<12xf32>
    %56 = vector.multi_reduction <add>, %55, %cst_32 [1] : vector<12x128xf32> to vector<12xf32>
    %57 = vector.shape_cast %56 : vector<12xf32> to vector<12x1xf32>
    %58 = arith.mulf %52, %52 : vector<4x128xf32>
    %cst_33 = arith.constant dense<0.000000e+00> : vector<1x4xf32>
    %59 = tpu.matmul %6, %58, %cst_33 {dimension_numbers = #tpu.dot_dimension_numbers<[1], [1], [0], [0], [0, 0, 1, 0], [], []>} : vector<1x128xf32>, vector<4x128xf32>, vector<1x4xf32> -> vector<1x4xf32>
    %cst_34 = arith.constant 1.000000e+00 : f32
    %60 = vector.broadcast %cst_34 : f32 to vector<12x4xf32>
    %61 = arith.mulf %60, %54 : vector<12x4xf32>
    %62 = vector.broadcast %57 : vector<12x1xf32> to vector<12x4xf32>
    %63 = arith.subf %62, %61 : vector<12x4xf32>
    %cst_35 = arith.constant 2.500000e-01 : f32
    %64 = vector.broadcast %cst_35 : f32 to vector<1x4xf32>
    %65 = arith.mulf %64, %59 : vector<1x4xf32>
    %66 = vector.broadcast %65 : vector<1x4xf32> to vector<12x4xf32>
    %67 = arith.addf %63, %66 : vector<12x4xf32>
    %cst_36 = arith.constant 0.000000e+00 : f32
    %68 = vector.broadcast %cst_36 : f32 to vector<12x4xf32>
    %69 = arith.subf %68, %67 : vector<12x4xf32>
    %c2 = arith.constant 2 : index
    %c0_37 = arith.constant 0 : index
    %c0_38 = arith.constant 0 : index
    %70 = vector.load %arg5[%c2, %c0_37, %c0_38] : memref<4x12x4xf32, #tpu.memory_space<vmem>>, vector<1x12x4xf32>
    %71 = vector.shape_cast %70 : vector<1x12x4xf32> to vector<12x4xf32>
    %72 = vector.shape_cast %69 : vector<12x4xf32> to vector<1x12x4xf32>
    tpu.vector_store %arg5[%c2, %c0_37, %c0_38], %72 {strides = array<i32>} : memref<4x12x4xf32, #tpu.memory_space<vmem>>, vector<1x12x4xf32>,
    %73 = vector.extract_strided_slice %3 {offsets = [60, 0], sizes = [20, 128], strides = [1, 1]} : vector<80x128xf32> to vector<20x128xf32>
    %cst_39 = arith.constant dense<0.000000e+00> : vector<4x128xf32>
    %74 = tpu.matmul %4, %73, %cst_39 {dimension_numbers = #tpu.dot_dimension_numbers<[1], [0], [0], [1], [0, 0, 1, 1], [], []>} : vector<4x20xf32>, vector<20x128xf32>, vector<4x128xf32> -> vector<4x128xf32>
    %cst_40 = arith.constant dense<0.000000e+00> : vector<12x128xf32>
    %75 = tpu.matmul %5, %73, %cst_40 {dimension_numbers = #tpu.dot_dimension_numbers<[1], [0], [0], [1], [0, 0, 1, 1], [], []>} : vector<12x20xf32>, vector<20x128xf32>, vector<12x128xf32> -> vector<12x128xf32>
    %cst_41 = arith.constant dense<0.000000e+00> : vector<12x4xf32>
    %76 = tpu.matmul %75, %74, %cst_41 {dimension_numbers = #tpu.dot_dimension_numbers<[1], [1], [0], [0], [0, 0, 1, 0], [], []>} : vector<12x128xf32>, vector<4x128xf32>, vector<12x4xf32> -> vector<12x4xf32>
    %77 = arith.mulf %75, %75 : vector<12x128xf32>
    %cst_42 = arith.constant dense<0.000000e+00> : vector<12xf32>
    %78 = vector.multi_reduction <add>, %77, %cst_42 [1] : vector<12x128xf32> to vector<12xf32>
    %79 = vector.shape_cast %78 : vector<12xf32> to vector<12x1xf32>
    %80 = arith.mulf %74, %74 : vector<4x128xf32>
    %cst_43 = arith.constant dense<0.000000e+00> : vector<1x4xf32>
    %81 = tpu.matmul %6, %80, %cst_43 {dimension_numbers = #tpu.dot_dimension_numbers<[1], [1], [0], [0], [0, 0, 1, 0], [], []>} : vector<1x128xf32>, vector<4x128xf32>, vector<1x4xf32> -> vector<1x4xf32>
    %cst_44 = arith.constant 1.000000e+00 : f32
    %82 = vector.broadcast %cst_44 : f32 to vector<12x4xf32>
    %83 = arith.mulf %82, %76 : vector<12x4xf32>
    %84 = vector.broadcast %79 : vector<12x1xf32> to vector<12x4xf32>
    %85 = arith.subf %84, %83 : vector<12x4xf32>
    %cst_45 = arith.constant 2.500000e-01 : f32
    %86 = vector.broadcast %cst_45 : f32 to vector<1x4xf32>
    %87 = arith.mulf %86, %81 : vector<1x4xf32>
    %88 = vector.broadcast %87 : vector<1x4xf32> to vector<12x4xf32>
    %89 = arith.addf %85, %88 : vector<12x4xf32>
    %cst_46 = arith.constant 0.000000e+00 : f32
    %90 = vector.broadcast %cst_46 : f32 to vector<12x4xf32>
    %91 = arith.subf %90, %89 : vector<12x4xf32>
    %c3 = arith.constant 3 : index
    %c0_47 = arith.constant 0 : index
    %c0_48 = arith.constant 0 : index
    %92 = vector.load %arg5[%c3, %c0_47, %c0_48] : memref<4x12x4xf32, #tpu.memory_space<vmem>>, vector<1x12x4xf32>
    %93 = vector.shape_cast %92 : vector<1x12x4xf32> to vector<12x4xf32>
    %94 = vector.shape_cast %91 : vector<12x4xf32> to vector<1x12x4xf32>
    tpu.vector_store %arg5[%c3, %c0_47, %c0_48], %94 {strides = array<i32>} : memref<4x12x4xf32, #tpu.memory_space<vmem>>, vector<1x12x4xf32>,
    return
  }
  func.func @transform_0(%arg0: i32) -> (i32, i32) {
    %c0_i32 = arith.constant 0 : i32
    %c0_i32_0 = arith.constant 0 : i32
    return %arg0, %c0_i32 : i32, i32
  }
  func.func @transform_1(%arg0: i32) -> (i32, i32) {
    %c0_i32 = arith.constant 0 : i32
    %c0_i32_0 = arith.constant 0 : i32
    %c0_i32_1 = arith.constant 0 : i32
    return %c0_i32, %c0_i32_0 : i32, i32
  }
  func.func @transform_2(%arg0: i32) -> (i32, i32) {
    %c0_i32 = arith.constant 0 : i32
    %c0_i32_0 = arith.constant 0 : i32
    %c0_i32_1 = arith.constant 0 : i32
    return %c0_i32, %c0_i32_0 : i32, i32
  }
  func.func @transform_3(%arg0: i32) -> (i32, i32) {
    %c0_i32 = arith.constant 0 : i32
    %c0_i32_0 = arith.constant 0 : i32
    %c0_i32_1 = arith.constant 0 : i32
    return %c0_i32, %c0_i32_0 : i32, i32
  }
  func.func @transform_4(%arg0: i32) -> (i32, i32, i32) {
    %c0_i32 = arith.constant 0 : i32
    %c0_i32_0 = arith.constant 0 : i32
    %c0_i32_1 = arith.constant 0 : i32
    return %arg0, %c0_i32, %c0_i32_0 : i32, i32, i32
  }
}

</mosaic_0001>

<bundles_post_ra>
// kernel: tpu_custom_call.1
= control target key start
LH: loop header
LB: loop body
LE: loop exit
PB: predicated region body
PF: predicated region fallthrough
CT: control target
= control target key end

     0   :  { %9 = vsyncpa [#allocation3], 0  ;;  %s2679_s0 = inlined_call_operand.hbm [shape: f32[160,128], index: 0, kind: input, shape index: {}]   ;;  %s2680_s1 = inlined_call_operand.hbm [shape: bf16[128,128], index: 1, kind: input, shape index: {}]   ;;  %s2681_s2 = inlined_call_operand.hbm [shape: f32[4,20], index: 2, kind: input, shape index: {}]   ;;  %s2682_s3 = inlined_call_operand.hbm [shape: f32[12,20], index: 3, kind: input, shape index: {}]   ;;  %s2683_s4 = inlined_call_operand.vmem [shape: f32[8,12,4], index: 4, kind: output, shape index: {}]  }
   0x1   :  { %11 = vsyncpa [#allocation3 + $0x1], 0 }
   0x2   :  { %12 = vsyncpa [#allocation5], 0 }
   0x3   :  { %13 = vsyncpa [#allocation8], 0  ;;  %s2349_s15 = smov 0   ;;  %s2351_s16 = smov 0  }
   0x4   :  { %s2353_s17 = smov 0   ;;  %s2355_s18 = smov 0  }
   0x5 LB: > { %s1806_s19 = sadd.s32 4294967295, %s2311_s18   ;;  %p39_p0 = scmp.ne.s32.totalorder %s2303_s16, %s2299_s15  ;;  %s2311_s18 = sphi %s2355_s18, %s2699_s18   ;;  %s2307_s17 = sphi %s2353_s17, %s2698_s17   ;;  %s2303_s16 = sphi %s2351_s16, %s2697_s16   ;;  %s2299_s15 = sphi %s2349_s15, %s2696_s15  }
   0x6   : > { %p2371_p1 = scmp.eq.s32.totalorder %s1806_s19, 0  ;;  %p1808_p2 = scmp.ge.s32.totalorder %s2311_s18, 1 }
   0x7   : > { %p139_p3 = scmp.lt.s32.totalorder %s2311_s18, 3  ;;  %s2313_s23 = smov [#allocation4]  }
   0x8   : > { %s2688_s20 = scalar_select %p2371_p1, 1, 0 }
   0x9   : > { %p2379_p4 = por %p2371_p1, %p39_p0  ;;  %p2383_p5 = pnand %p1808_p2, %p139_p3 }
   0xa   : > { %s151_s24 = sshll.u32 %s2313_s23, 4  ;;  %s2314_s26 = smov [#allocation6]   ;;  %s152_s24 = int_to_ptr.vmem [resolvable:$true] %s151_s24 }
   0xb   : > { %s2689_s21 = scalar_select %p2379_p4, 1, 0 }
   0xc   : > { %s2690_s22 = scalar_select %p2383_p5, 1, 0 }
   0xd   : > { %p2092_p6 = pneg %p2383_p5  ;;  %s165_s27 = sshll.u32 %s2314_s26, 4  ;;  %s166_s27 = int_to_ptr.vmem [resolvable:$true] %s165_s27 }
   0xe   : > { %s2315_s28 = smov [#allocation7]   ;;  %s2174_s30 = scalar_lea.vmem %s152_s24, 1024 }
   0xf   : > { %p2391_p7 = pnand %p2092_p6, %p2371_p1  ;;  %s175_s29 = sshll.u32 %s2315_s28, 4  ;;  %s176_s29 = int_to_ptr.vmem [resolvable:$true] %s175_s29 }
  0x10   : > { %p2175_p9 = scmp.ne.s32.totalorder %s152_s24, %s2174_s30  ;;  %p2182_p12 = scmp.lt.s32.totalorder %s152_s24, %s152_s24 }
  0x11   : > { %p2165_p8 = pneg %p2391_p7  ;;  %p2183_p13 = scmp.lt.s32.totalorder %s2174_s30, %s2174_s30 }
  0x13   : > { %p2177_p10 = pnand %p2175_p9, %p2165_p8  ;;  %p2184_p0 = por %p2183_p13, %p2182_p12 }
  0x15   : > { %p2178_p11 = pneg %p2177_p10 }
  0x17   : > { %p2185_p2 = pnand %p2184_p0, %p2178_p11 }
  0x19   : > { %2188 = shalt.err (!%p2185_p2)
}
  0x1a   : > { %s2316_s5 = smov 64   ;;  %s2317_s6 = smov 4  }
  0x1b   : > { %2095 = dma.hbm_to_vmem [thread:$0]  (!%p2391_p7), %s2680_s1, 1024, %s152_s24, [#allocation5], %s2316_s5, %s2316_s5, %s2317_s6  }
  0x1c   : > { %s2200_s9 = scalar_lea.vmem %s166_s27, 64  ;;  %p2208_p10 = scmp.lt.s32.totalorder %s166_s27, %s166_s27 }
  0x1d   : > { %p2201_p3 = scmp.ne.s32.totalorder %s166_s27, %s2200_s9  ;;  %p2209_p1 = scmp.lt.s32.totalorder %s2200_s9, %s2200_s9 }
  0x1f   : > { %p2203_p6 = pnand %p2201_p3, %p2165_p8  ;;  %p2210_p12 = por %p2209_p1, %p2208_p10 }
  0x21   : > { %p2204_p9 = pneg %p2203_p6 }
  0x23   : > { %p2211_p11 = pnand %p2210_p12, %p2204_p9 }
  0x25   : > { %2214 = shalt.err (!%p2211_p11)
}
  0x26   : > { %2098 = dma.hbm_to_vmem [thread:$0]  (!%p2391_p7), %s2681_s2, 64, %s166_s27, [#allocation5]  }
  0x27   : > { %s2226_s12 = scalar_lea.vmem %s176_s29, 256  ;;  %p2234_p3 = scmp.lt.s32.totalorder %s176_s29, %s176_s29 }
  0x28   : > { %p2227_p13 = scmp.ne.s32.totalorder %s176_s29, %s2226_s12  ;;  %p2235_p6 = scmp.lt.s32.totalorder %s2226_s12, %s2226_s12 }
  0x2a   : > { %p2229_p0 = pnand %p2227_p13, %p2165_p8  ;;  %p2236_p4 = por %p2235_p6, %p2234_p3 }
  0x2c   : > { %p2230_p2 = pneg %p2229_p0 }
  0x2e   : > { %p2237_p1 = pnand %p2236_p4, %p2230_p2 }
  0x30   : > { %2240 = shalt.err (!%p2237_p1)
}
  0x31   : > { %s2318_s13 = smov 128   ;;  %s2319_s14 = smov 8  }
  0x32   : > { %2101 = dma.hbm_to_vmem [thread:$0]  (!%p2391_p7), %s2682_s3, 256, %s176_s29, [#allocation8], %s2318_s13, %s2318_s13, %s2319_s14  }
  0x33   : > { %s2425_s24 = sadd.s32 1, %s2311_s18   ;;  %s26_s27 = sadd.s32 1, %s2307_s17 }
  0x34   : > { %s23_s26 = ssub.s32 %s2311_s18, %s2425_s24  ;;  %p33_p8 = scmp.ne.s32.totalorder %s2307_s17, %s2303_s16 }
  0x35   : > { %p24_p4 = scmp.eq.s32.totalorder %s23_s26, 0  ;;  %p34_p9 = scmp.eq.s32.totalorder %s2311_s18, 0 }
  0x36   : > { %p2109_p10 = scmp.lt.s32.totalorder %s2311_s18, 2  ;;  %s189_s25 = sand.u32 1, %s2307_s17  }
  0x37   : > { %s2435_s28 = scalar_select %p24_p4, %s2307_s17, %s26_s27  }
  0x38   : > { %p35_p12 = por %p34_p9, %p33_p8  ;;  %s2076_s30 = smul.u32 80, %s189_s25 }
  0x39   : > { %s1857_s5 = smul.u32 1280, %s2311_s18  ;;  %s2450_s11 = scalar_lea.sflag [#allocation3], %s189_s25 }
  0x3a   : > { %p2439_p11 = pnand %p2109_p10, %p35_p12  ;;  %s193_s9 = scalar_lea.vmem [#allocation2], %s2076_s30 }
  0x3b   : > { %s2446_s8 = scalar_lea.hbm %s2679_s0, %s1857_s5  ;;  %s200_s10 = sshll.u32 %s193_s9, 4  ;;  %s2448_s10 = int_to_ptr.vmem [resolvable:$true] %s200_s10 }
  0x3c   : > { %s2241_s12 = scalar_lea.hbm %s2446_s8, 1280  ;;  %p2243_p13 = pneg %p2439_p11 }
  0x3d   : > { %p2242_p7 = scmp.ne.s32.totalorder %s2446_s8, %s2241_s12  ;;  %s2246_s26 = scalar_lea.hbm %s2679_s0, 2560 }
  0x3e   : > { %p2247_p3 = scmp.lt.s32.totalorder %s2446_s8, %s2679_s0  ;;  %p2248_p6 = scmp.lt.s32.totalorder %s2246_s26, %s2241_s12 }
  0x3f   : > { %p2244_p0 = pnand %p2243_p13, %p2242_p7 }
  0x40   : > { %p2249_p1 = por %p2248_p6, %p2247_p3 }
  0x41   : > { %p2245_p2 = pneg %p2244_p0 }
  0x43   : > { %p2250_p4 = pnand %p2249_p1, %p2245_p2 }
  0x45   : > { %2253 = shalt.err (!%p2250_p4)
}
  0x46   : > { %s2254_s25 = scalar_lea.vmem %s2448_s10, 1280  ;;  %s2320_s30 = smov [#allocation2]  }
  0x47   : > { %p2255_p8 = scmp.ne.s32.totalorder %s2448_s10, %s2254_s25  ;;  %s2259_s29 = sshll.u32 %s2320_s30, 4  ;;  %s2260_s29 = int_to_ptr.vmem [resolvable:$false] %s2259_s29 }
  0x48   : > { %s2261_s7 = scalar_lea.vmem %s2260_s29, 2560  ;;  %p2262_p12 = scmp.lt.s32.totalorder %s2448_s10, %s2260_s29 }
  0x49   : > { %p2257_p9 = pnand %p2255_p8, %p2243_p13  ;;  %p2263_p7 = scmp.lt.s32.totalorder %s2261_s7, %s2254_s25 }
  0x4b   : > { %p2258_p10 = pneg %p2257_p9  ;;  %p2264_p0 = por %p2263_p7, %p2262_p12 }
  0x4d   : > { %p2265_p5 = pnand %p2264_p0, %p2258_p10 }
  0x4f   : > { %2268 = shalt.err (!%p2265_p5)
}
  0x50   : > { %2105 = dma.hbm_to_vmem [thread:$0]  (!%p2439_p11), %s2446_s8, 1280, %s2448_s10, %s2450_s11, %s2318_s13, %s2318_s13, %s2319_s14  }
  0x51   : > { %p2693_p13 = scmp.ne.s32.totalorder %s2690_s22, 0 }
  0x52   : > { %s214_s9 = sand.u32 (!%p2693_p13), 1, %s2303_s16   ;;  %p2694_p5 = scmp.ne.s32.totalorder (!%p2693_p13), %s2689_s21, 0 }
  0x53   : > { %212 = sbr.rel (%p2693_p13) target bundleno = 1374 (0x55e), region = 36  ;;  %s215_s15 = scalar_lea.sflag (!%p2693_p13), [#allocation3], %s214_s9 }
  0x54   : > { %s2077_s12 = smul.u32 (!%p2693_p13), 80, %s214_s9 }
  0x56   : > { %s2477_s23 = scalar_lea.vmem (!%p2693_p13), [#allocation2], %s2077_s12 }
  0x58   : > { %2286 = dma.done.wait (%p2694_p5), %s215_s15, 1280  }
  0x59   : > { %2288 = vsyncadd (%p2694_p5), %s215_s15, 4294966016  ;;  %p2695_p2 = scmp.ne.s32.totalorder %s2688_s20, 0 }
  0x5b   : > { %2290 = dma.done.wait (%p2695_p2), [#allocation5], 1088  }
  0x5c   : > { %2292 = vsyncadd (%p2695_p2), [#allocation5], 4294966208 }
  0x5d   : > { %2294 = dma.done.wait (%p2695_p2), [#allocation8], 256  }
  0x5e   : > { %2296 = vsyncadd (%p2695_p2), [#allocation8], 4294967040  ;;  %v2321_v0 = vmov 0.0   ;;  %vm2322_vm0 = vmmov 0   ;;  %v2155_v1 = vld [vmem:[#allocation4 + $0x38] sm:$0xff]   ;;  %v2156_v2 = vld [vmem:[#allocation4 + $0x30] sm:$0xff]  }
  0x5f   : > { %1928 = vmatprep.subr.bf16.mxu0 %v2321_v0  ;;  %1944 = vmatprep.mubr.msk.bf16.mxu0 %vm2322_vm0, %v2321_v0  ;;  %v2157_v3 = vld [vmem:[#allocation4 + $0x28] sm:$0xff]   ;;  %v2158_v4 = vld [vmem:[#allocation4 + $0x20] sm:$0xff]   ;;  %v2159_v5 = vld [vmem:[#allocation4 + $0x18] sm:$0xff]   ;;  %vm424_vm1 = vcmask 1043456   ;;  %vm420_vm2 = vcmask 162816   ;;  %v2323_v52 = vmov 1.0  }
  0x60   : > { %1964 = vmatprep.subr.mxu1 %v2321_v0  ;;  %1970 = vmatprep.mubr.msk.f32.mxu1 %vm2322_vm0, %v2321_v0  ;;  %v2160_v6 = vld [vmem:[#allocation4 + $0x10] sm:$0xff]   ;;  %v2161_v7 = vld [vmem:[#allocation4 + $0x8] sm:$0xff]   ;;  %v2162_v8 = vld [vmem:[#allocation4] sm:$0xff]   ;;  %s1818_s20 = sshll.u32 %s1806_s19, 2  ;;  %vm743_vm3 = vcmask 31744   ;;  %vm745_vm4 = vcmask 27648  }
  0x61   : > { %1929 = vmatpush3.bf16.msra.mxu0 %v2155_v1  ;;  %v265_v9 = vld [vmem:[%s2477_s23] sm:$0xff]  ;;  %v266_v10 = vld [vmem:[%s2477_s23 + $0x8] sm:$0xff]  ;;  %v267_v12 = vld [vmem:[%s2477_s23 + $0x10] sm:$0xff]  ;;  %p258_p11 = scmp.lt.s32.totalorder %s1818_s20, 7 }
  0x62   : > { %1930 = vmatprep.subr.bf16.mxu0 %v2321_v0  ;;  %v275_v11 = vpack.c.bf16 %v266_v10, %v265_v9  ;;  %v268_v13 = vld [vmem:[%s2477_s23 + $0x18] sm:$0xff]  ;;  %v269_v15 = vld [vmem:[%s2477_s23 + $0x20] sm:$0xff]  ;;  %v270_v16 = vld [vmem:[%s2477_s23 + $0x28] sm:$0xff] }
  0x63   : > { %v276_v14 = vpack.c.bf16 %v268_v13, %v267_v12  ;;  %v277_v17 = vpack.c.bf16 %v270_v16, %v269_v15  ;;  %v2518_v24 = vld [vmem:[#allocation6] sm:$0xf]  ;;  %v2521_v26 = vld [vmem:[#allocation7] sm:$0xff]  ;;  %v2530_v33 = vld [vmem:[#allocation7 + $0x8] sm:$0xf]  ;;  %s2701_s20 = smov (!%p258_p11, %s1818_s20), 7 }
  0x64   : > { %v271_v38 = vld [vmem:[%s2477_s23 + $0x30] sm:$0xff]  ;;  %v272_v39 = vld [vmem:[%s2477_s23 + $0x38] sm:$0xff]  ;;  %v273_v41 = vld [vmem:[%s2477_s23 + $0x40] sm:$0xff]  ;;  %s1858_s21 = sshll.u32 %s2701_s20, 4 }
  0x65   : > { %1931 = vmatpush3.bf16.msra.mxu0 %v2156_v2  ;;  %v278_v40 = vpack.c.bf16 %v272_v39, %v271_v38  ;;  %v274_v42 = vld [vmem:[%s2477_s23 + $0x48] sm:$0xff]  ;;  %s2596_s22 = scalar_lea.vmem %s2683_s4, %s1858_s21 }
  0x66   : > { %1932 = vmatprep.subr.bf16.mxu0 %v2321_v0  ;;  %v279_v43 = vpack.c.bf16 %v274_v42, %v273_v41 }
  0x69   : > { %1933 = vmatpush3.bf16.msra.mxu0 %v2157_v3  ;;  %v735_v3 = vlaneseq }
  0x6a   : > { %1934 = vmatprep.subr.bf16.mxu0 %v2321_v0 }
  0x6d   : > { %1935 = vmatpush3.bf16.msra.mxu0 %v2158_v4  ;;  %v736_v4 = vshrl.u32 %v735_v3, 7 }
  0x6e   : > { %1936 = vmatprep.subr.bf16.mxu0 %v2321_v0 }
  0x71   : > { %1937 = vmatpush3.bf16.msra.mxu0 %v2159_v5 }
  0x72   : > { %1938 = vmatprep.subr.bf16.mxu0 %v2321_v0 }
  0x75   : > { %1939 = vmatpush3.bf16.msra.mxu0 %v2160_v6 }
  0x76   : > { %1940 = vmatprep.subr.bf16.mxu0 %v2321_v0 }
  0x79   : > { %1941 = vmatpush3.bf16.msra.mxu0 %v2161_v7 }
  0x7a   : > { %1942 = vmatprep.subr.bf16.mxu0 %v2321_v0 }
  0x7d   : > { %1943 = vmatpush3.bf16.msra.mxu0 %v2162_v8  ;;  %v2590_v8 = vsub.s32 0, %v736_v4 }
  0x80   : > { %1945 = vmatmul.mubr.bf16.vlgmr.msra.gmra.mxu0 %v275_v11 }
  0x81   : > { %1948 = vmatprep.mubr.msk.bf16.mxu0 %vm2322_vm0, %v2321_v0 }
  0x88   : > { %1949 = vmatmul.mubr.bf16.gmra.mxu0 %v276_v14 }
  0x89   : > { %1952 = vmatprep.mubr.msk.bf16.mxu0 %vm2322_vm0, %v2321_v0 }
  0x90   : > { %1953 = vmatmul.mubr.bf16.gmra.mxu0 %v277_v17 }
  0x91   : > { %1956 = vmatprep.mubr.msk.bf16.mxu0 %vm2322_vm0, %v2321_v0 }
  0x98   : > { %1957 = vmatmul.mubr.bf16.gmra.mxu0 %v278_v40 }
  0x99   : > { %1960 = vmatprep.mubr.msk.bf16.mxu0 %vm2322_vm0, %v2321_v0 }
  0xa0   : > { %1961 = vmatmul.mubr.bf16.gmra.mxu0 %v279_v43 }
  0xa1   : > { %2063 = vmatprep.mubr.msk.f32.mxu0 %vm420_vm2, %v2521_v26 }
 0x140   : > { %v378_v18 = vpop.f32.mrf.mxu0 }
 0x142   : > { %v1946_v19 = vpop.f32.mrf.mxu0 }
 0x144   : > { %v381_v20 = vpop.f32.mrf.mxu0 }
 0x146   : > { %v1947_v21 = vpop.f32.mrf.mxu0 }
 0x148   : > { %v386_v22 = vpop.f32.mrf.mxu0 }
 0x149   : > { %1965 = vmatpush3.msk.msra.mxu1 %vm424_vm1, %v386_v22  ;;  %v749_v27 = vrot.slane %v386_v22, 4 }
 0x14a   : > { %v1950_v23 = vpop.f32.mrf.mxu0  ;;  %1966 = vmatprep.subr.mxu1 %v2321_v0 }
 0x14b   : > { %1967 = vmatpush3.msra.mxu1 %v381_v20 }
 0x14c   : > { %v389_v25 = vpop.f32.mrf.mxu0  ;;  %1968 = vmatprep.subr.mxu1 %v2321_v0 }
 0x14d   : > { %v750_v28 = vrot.slane %v389_v25, 4  ;;  %1969 = vmatpush3.msra.mxu1 %v378_v18 }
 0x14e   : > { %v1951_v29 = vpop.f32.mrf.mxu0  ;;  %1971 = vmatmul.mubr.msk.f32.vlgmr.msra.gmra.mxu1 %vm420_vm2, %v2518_v24  ;;  %1973 = vmatprep.subr.msk.mxu1 %vm424_vm1, %v386_v22 }
 0x14f   : > { %1974 = vmatpush3.msk.msra.mxu1 %vm424_vm1, %v386_v22  ;;  %1979 = vmatprep.mubr.msk.f32.mxu1 %vm420_vm2, %v2521_v26  ;;  %v751_v30 = vsel %vm424_vm1, %v749_v27, %v750_v28 }
 0x150   : > { %v394_v31 = vpop.f32.mrf.mxu0  ;;  %1975 = vmatprep.subr.mxu1 %v381_v20 }
 0x151   : > { %v752_v32 = vrot.slane %v394_v31, 4  ;;  %1976 = vmatpush3.msra.mxu1 %v381_v20 }
 0x152   : > { %1977 = vmatprep.subr.mxu1 %v378_v18  ;;  %v1954_v34 = vpop.f32.mrf.mxu0 }
 0x153   : > { %1978 = vmatpush3.msra.mxu1 %v378_v18  ;;  %v753_v35 = vsel %vm424_vm1, %v750_v28, %v752_v32 }
 0x154   : > { %1980 = vmatmul.mubr.msk.f32.vlgmr.msra.gmra.mxu1 %vm420_vm2, %v2530_v33  ;;  %v2535_v36 = vpop.f32.mrf.mxu0 }
 0x156   : > { %v1955_v37 = vpop.f32.mrf.mxu0 }
 0x158   : > { %v2564_v53 = vpop.f32.mrf.mxu0 }
 0x15a   : > { %v1958_v54 = vpop.f32.mrf.mxu0 }
 0x15c   : > { %v2566_v55 = vpop.f32.mrf.mxu0 }
 0x15d   : > { %v1387_v62 = vrot.slane %v2566_v55, 4 }
 0x15e   : > { %v1959_v56 = vpop.f32.mrf.mxu0 }
 0x160   : > { %v410_v57 = vpop.f32.mrf.mxu0 }
 0x161   : > { %v1388_v60 = vrot.slane %v410_v57, 4 }
 0x162   : > { %v1962_v58 = vpop.f32.mrf.mxu0 }
 0x163   : > { %v2581_v2 = vsel %vm424_vm1, %v1387_v62, %v1388_v60 }
 0x164   : > { %v413_v59 = vpop.f32.mrf.mxu0 }
 0x165   : > { %v2568_v61 = vrot.slane %v413_v59, 4 }
 0x166   : > { %v1963_v63 = vpop.f32.mrf.mxu0 }
 0x167   : > { %2057 = vmatprep.subr.msk.mxu0 %vm424_vm1, %v2568_v61  ;;  %v2577_v1 = vsel %vm424_vm1, %v1388_v60, %v2568_v61 }
 0x168   : > { %2058 = vmatpush3.msk.msra.mxu0 %vm424_vm1, %v2568_v61 }
 0x169   : > { %2059 = vmatprep.subr.mxu0 %v2577_v1 }
 0x16a   : > { %2060 = vmatpush3.msra.mxu0 %v2577_v1 }
 0x16b   : > { %2061 = vmatprep.subr.mxu0 %v2581_v2 }
 0x16c   : > { %2062 = vmatpush3.msra.mxu0 %v2581_v2 }
 0x16d   : > { %2064 = vmatmul.mubr.msk.f32.vlgmr.msra.gmra.mxu0 %vm420_vm2, %v2530_v33 }
 0x20e   : > { %v494_v44 = vpop.f32.mrf.mxu1 }
 0x20f   : > { %1982 = vmatprep.subr.mxu1 %v494_v44  ;;  %v661_v49 = vmul.f32 %v494_v44, %v494_v44 }
 0x210   : > { %v1972_v45 = vpop.f32.mrf.mxu1  ;;  %1983 = vmatpush3.xpose.msra.mxu1 %v494_v44 }
 0x211   : > { %1987 = vmatprep.subr.mxu1 %v2321_v0 }
 0x214   : > { %v1981_v46 = vpop.f32.mrf.mxu1 }
 0x215   : > { %v655_v47 = vmul.f32 %v1981_v46, %v1981_v46 }
 0x216   : > { %v570_v48 = vpop.f32.mrf.mxu1 }
 0x217   : > { %1984 = vmatprep.mubr.f32.mxu1 %v570_v48  ;;  %v658_v50 = vsel %vm424_vm1, %v655_v47, 0.0  ;;  %v654_v51 = vmul.f32 %v570_v48, %v570_v48 }
 0x218   : > { %659 = vadd.xlane.f32.xlu0 %v658_v50  ;;  %1985 = vmatmul.mubr.f32.vlgmr.msra.gmra.mxu1 %v1981_v46 }
 0x219   : > { %1988 = vmatpush3.xpose.msra.mxu1 %v661_v49  ;;  %1989 = vmatprep.mubr.msk.f32.mxu1 %vm2322_vm0, %v2321_v0 }
 0x21a   : > { %1992 = vmatprep.subr.mxu1 %v2321_v0 }
 0x21c   : > { %656 = vadd.xlane.f32.xlu0 %v654_v51  ;;  %1990 = vmatmul.mubr.f32.vlgmr.msra.gmra.mxu1 %v2323_v52 }
 0x21d   : > { %1993 = vmatpush3.msk.msra.mxu1 %vm424_vm1, %v752_v32  ;;  %1998 = vmatprep.mubr.msk.f32.mxu1 %vm2322_vm0, %v2321_v0 }
 0x21e   : > { %1994 = vmatprep.subr.mxu1 %v2321_v0 }
 0x21f   : > { %1995 = vmatpush3.msra.mxu1 %v753_v35 }
 0x220   : > { %1996 = vmatprep.subr.mxu1 %v2321_v0 }
 0x221   : > { %1997 = vmatpush3.msra.mxu1 %v751_v30 }
 0x222   : > { %1999 = vmatmul.mubr.msk.f32.vlgmr.msra.gmra.mxu1 %vm420_vm2, %v2518_v24  ;;  %2001 = vmatprep.subr.msk.mxu1 %vm424_vm1, %v752_v32 }
 0x223   : > { %2002 = vmatpush3.msk.msra.mxu1 %vm424_vm1, %v752_v32  ;;  %2007 = vmatprep.mubr.msk.f32.mxu1 %vm420_vm2, %v2521_v26 }
 0x224   : > { %2003 = vmatprep.subr.mxu1 %v753_v35 }
 0x225   : > { %2004 = vmatpush3.msra.mxu1 %v753_v35 }
 0x226   : > { %2005 = vmatprep.subr.mxu1 %v751_v30 }
 0x227   : > { %2006 = vmatpush3.msra.mxu1 %v751_v30 }
 0x228   : > { %2008 = vmatmul.mubr.msk.f32.vlgmr.msra.gmra.mxu1 %vm420_vm2, %v2530_v33 }
 0x22d   : > { %v2065_v51 = vpop.f32.mrf.mxu0 }
 0x22e   : > { %v1617_v54 = vmul.f32 %v2065_v51, %v2065_v51 }
 0x230   : > { %v1620_v56 = vsel %vm424_vm1, %v1617_v54, 0.0 }
 0x2a1   : > { %v660_v5 = vpop.xlane.xlu0 %659 }
 0x2a5   : > { %v657_v11 = vpop.xlane.xlu0 %656 }
 0x2d8   : > { %v1986_v6 = vpop.f32.mrf.mxu1 }
 0x2d9   : > { %v733_v13 = vsub.f32 %v660_v5, %v1986_v6 }
 0x2da   : > { %v645_v7 = vpop.f32.mrf.mxu1 }
 0x2db   : > { %v732_v14 = vsub.f32 %v657_v11, %v645_v7 }
 0x2dc   : > { %v728_v9 = vpop.f32.mrf.mxu1 }
 0x2dd   : > { %v734_v10 = vmul.f32 0.25, %v728_v9 }
 0x2de   : > { %v1991_v12 = vpop.f32.mrf.mxu1 }
 0x2df   : > { %v738_v15 = vrot.slane %v734_v10, %v2590_v8 }
 0x2e1   : > { %v739_v16 = vadd.f32 %v738_v15, %v732_v14  ;;  %v740_v17 = vadd.f32 %v738_v15, %v733_v13 }
 0x2e2   : > { %v824_v18 = vpop.f32.mrf.mxu1 }
 0x2e3   : > { %v741_v19 = vsub.f32 0.0, %v739_v16  ;;  %v742_v20 = vsub.f32 0.0, %v740_v17  ;;  %2010 = vmatprep.subr.mxu1 %v824_v18  ;;  %v985_v27 = vmul.f32 %v824_v18, %v824_v18 }
 0x2e4   : > { %v2000_v21 = vpop.f32.mrf.mxu1  ;;  %2011 = vmatpush3.xpose.msra.mxu1 %v824_v18 }
 0x2e5   : > { %744 = vst.msk [vmem:[%s2596_s22] sm:$0xff] %vm743_vm3, %v741_v19  ;;  %2015 = vmatprep.subr.mxu1 %v2321_v0 }
 0x2e6   : > { %746 = vst.msk [vmem:[%s2596_s22 + $0x8] sm:$0xf] %vm745_vm4, %v742_v20 }
 0x2e8   : > { %v2009_v22 = vpop.f32.mrf.mxu1 }
 0x2e9   : > { %v979_v23 = vmul.f32 %v2009_v22, %v2009_v22 }
 0x2ea   : > { %v894_v25 = vpop.f32.mrf.mxu1 }
 0x2eb   : > { %2012 = vmatprep.mubr.f32.mxu1 %v894_v25  ;;  %v982_v28 = vsel %vm424_vm1, %v979_v23, 0.0  ;;  %v978_v29 = vmul.f32 %v894_v25, %v894_v25 }
 0x2ec   : > { %983 = vadd.xlane.f32.xlu1 %v982_v28  ;;  %2013 = vmatmul.mubr.f32.vlgmr.msra.gmra.mxu1 %v2009_v22 }
 0x2ed   : > { %2016 = vmatpush3.xpose.msra.mxu1 %v985_v27  ;;  %2017 = vmatprep.mubr.msk.f32.mxu1 %vm2322_vm0, %v2321_v0 }
 0x2ee   : > { %2020 = vmatprep.subr.mxu1 %v2321_v0 }
 0x2f0   : > { %980 = vadd.xlane.f32.xlu1 %v978_v29  ;;  %2018 = vmatmul.mubr.f32.vlgmr.msra.gmra.mxu1 %v2323_v52 }
 0x2f1   : > { %2021 = vmatpush3.msk.msra.mxu1 %vm424_vm1, %v2566_v55  ;;  %2026 = vmatprep.mubr.msk.f32.mxu1 %vm2322_vm0, %v2321_v0 }
 0x2f2   : > { %2022 = vmatprep.subr.mxu1 %v2321_v0 }
 0x2f3   : > { %2023 = vmatpush3.msra.mxu1 %v2564_v53 }
 0x2f4   : > { %2024 = vmatprep.subr.mxu1 %v2321_v0 }
 0x2f5   : > { %2025 = vmatpush3.msra.mxu1 %v2535_v36 }
 0x2f6   : > { %2027 = vmatmul.mubr.msk.f32.vlgmr.msra.gmra.mxu1 %vm420_vm2, %v2518_v24  ;;  %2029 = vmatprep.subr.msk.mxu1 %vm424_vm1, %v2566_v55 }
 0x2f7   : > { %2030 = vmatpush3.msk.msra.mxu1 %vm424_vm1, %v2566_v55  ;;  %2035 = vmatprep.mubr.msk.f32.mxu1 %vm420_vm2, %v2521_v26 }
 0x2f8   : > { %2031 = vmatprep.subr.mxu1 %v2564_v53 }
 0x2f9   : > { %2032 = vmatpush3.msra.mxu1 %v2564_v53  ;;  %v1532_v53 = vpop.f32.mrf.mxu0 }
 0x2fa   : > { %2033 = vmatprep.subr.mxu1 %v2535_v36  ;;  %v1616_v55 = vmul.f32 %v1532_v53, %v1532_v53 }
 0x2fb   : > { %2034 = vmatpush3.msra.mxu1 %v2535_v36 }
 0x2fc   : > { %2036 = vmatmul.mubr.msk.f32.vlgmr.msra.gmra.mxu1 %vm420_vm2, %v2530_v33 }
 0x375   : > { %v984_v30 = vpop.xlane.xlu1 %983 }
 0x379   : > { %v981_v37 = vpop.xlane.xlu1 %980 }
 0x3ac   : > { %v2014_v31 = vpop.f32.mrf.mxu1 }
 0x3ad   : > { %v1057_v38 = vsub.f32 %v984_v30, %v2014_v31 }
 0x3ae   : > { %v969_v32 = vpop.f32.mrf.mxu1 }
 0x3af   : > { %v1056_v39 = vsub.f32 %v981_v37, %v969_v32 }
 0x3b0   : > { %v1052_v34 = vpop.f32.mrf.mxu1 }
 0x3b1   : > { %v1058_v35 = vmul.f32 0.25, %v1052_v34 }
 0x3b2   : > { %v2019_v26 = vpop.f32.mrf.mxu1 }
 0x3b3   : > { %v1062_v40 = vrot.slane %v1058_v35, %v2590_v8 }
 0x3b5   : > { %v1063_v41 = vadd.f32 %v1062_v40, %v1056_v39  ;;  %v1064_v42 = vadd.f32 %v1062_v40, %v1057_v38 }
 0x3b6   : > { %v1139_v43 = vpop.f32.mrf.mxu1 }
 0x3b7   : > { %v1065_v36 = vsub.f32 0.0, %v1063_v41  ;;  %v1066_v44 = vsub.f32 0.0, %v1064_v42  ;;  %2038 = vmatprep.subr.mxu1 %v1139_v43  ;;  %v1300_v48 = vmul.f32 %v1139_v43, %v1139_v43 }
 0x3b8   : > { %v2028_v33 = vpop.f32.mrf.mxu1  ;;  %2039 = vmatpush3.xpose.msra.mxu1 %v1139_v43 }
 0x3b9   : > { %1839 = vst.msk [vmem:[%s2596_s22 + $0x10] sm:$0xff] %vm743_vm3, %v1065_v36  ;;  %2043 = vmatprep.subr.mxu1 %v2321_v0 }
 0x3ba   : > { %1840 = vst.msk [vmem:[%s2596_s22 + $0x18] sm:$0xf] %vm745_vm4, %v1066_v44 }
 0x3bc   : > { %v2037_v45 = vpop.f32.mrf.mxu1 }
 0x3bd   : > { %v1294_v46 = vmul.f32 %v2037_v45, %v2037_v45 }
 0x3be   : > { %v1209_v47 = vpop.f32.mrf.mxu1 }
 0x3bf   : > { %2040 = vmatprep.mubr.f32.mxu1 %v1209_v47  ;;  %v1297_v49 = vsel %vm424_vm1, %v1294_v46, 0.0  ;;  %v1293_v50 = vmul.f32 %v1209_v47, %v1209_v47 }
 0x3c0   : > { %1298 = vadd.xlane.f32.xlu1 %v1297_v49  ;;  %2041 = vmatmul.mubr.f32.vlgmr.msra.gmra.mxu1 %v2037_v45 }
 0x3c1   : > { %2044 = vmatpush3.xpose.msra.mxu1 %v1300_v48  ;;  %1295 = vadd.xlane.f32.xlu0 %v1293_v50 }
 0x3c2   : > { %2045 = vmatprep.mubr.msk.f32.mxu1 %vm2322_vm0, %v2321_v0  ;;  %2048 = vmatprep.subr.mxu1 %v2321_v0 }
 0x3c4   : > { %2046 = vmatmul.mubr.f32.vlgmr.msra.gmra.mxu1 %v2323_v52  ;;  %1621 = vadd.xlane.f32.xlu1 %v1620_v56 }
 0x3c5   : > { %2049 = vmatpush3.msk.msra.mxu1 %vm424_vm1, %v2568_v61  ;;  %2054 = vmatprep.mubr.msk.f32.mxu1 %vm2322_vm0, %v2321_v0 }
 0x3c6   : > { %2050 = vmatprep.subr.mxu1 %v2321_v0  ;;  %1618 = vadd.xlane.f32.xlu0 %v1616_v55 }
 0x3c7   : > { %2051 = vmatpush3.msra.mxu1 %v2577_v1 }
 0x3c8   : > { %2052 = vmatprep.subr.mxu1 %v2321_v0 }
 0x3c9   : > { %2053 = vmatpush3.msra.mxu1 %v2581_v2 }
 0x3ca   : > { %2055 = vmatmul.mubr.msk.f32.vlgmr.msra.gmra.mxu1 %vm420_vm2, %v2518_v24 }
 0x3cb   : > { %2068 = vmatprep.mubr.f32.mxu1 %v1532_v53 }
 0x449   : > { %v1299_v60 = vpop.xlane.xlu1 %1298 }
 0x44a   : > { %v1296_v62 = vpop.xlane.xlu0 %1295 }
 0x44d   : > { %v1622_v16 = vpop.xlane.xlu1 %1621 }
 0x44f   : > { %v1619_v14 = vpop.xlane.xlu0 %1618 }
 0x480   : > { %v2042_v57 = vpop.f32.mrf.mxu1 }
 0x481   : > { %v1372_v1 = vsub.f32 %v1299_v60, %v2042_v57 }
 0x482   : > { %v1284_v58 = vpop.f32.mrf.mxu1 }
 0x483   : > { %v1371_v24 = vsub.f32 %v1296_v62, %v1284_v58 }
 0x484   : > { %v1367_v59 = vpop.f32.mrf.mxu1 }
 0x485   : > { %v1373_v61 = vmul.f32 0.25, %v1367_v59 }
 0x486   : > { %v2047_v63 = vpop.f32.mrf.mxu1 }
 0x487   : > { %v1377_v2 = vrot.slane %v1373_v61, %v2590_v8 }
 0x489   : > { %v1378_v3 = vadd.f32 %v1377_v2, %v1371_v24  ;;  %v1379_v4 = vadd.f32 %v1377_v2, %v1372_v1 }
 0x48a   : > { %v1462_v5 = vpop.f32.mrf.mxu1 }
 0x48b   : > { %v1380_v6 = vsub.f32 0.0, %v1378_v3  ;;  %v1381_v7 = vsub.f32 0.0, %v1379_v4  ;;  %2066 = vmatprep.subr.mxu1 %v1462_v5  ;;  %v1623_v10 = vmul.f32 %v1462_v5, %v1462_v5 }
 0x48c   : > { %v2056_v9 = vpop.f32.mrf.mxu1  ;;  %2067 = vmatpush3.xpose.msra.mxu1 %v1462_v5 }
 0x48d   : > { %1846 = vst.msk [vmem:[%s2596_s22 + $0x20] sm:$0xff] %vm743_vm3, %v1380_v6  ;;  %2071 = vmatprep.subr.mxu1 %v2321_v0 }
 0x48e   : > { %1847 = vst.msk [vmem:[%s2596_s22 + $0x28] sm:$0xf] %vm745_vm4, %v1381_v7 }
 0x48f   : > { %2069 = vmatmul.mubr.f32.vlgmr.msra.gmra.mxu1 %v2065_v51 }
 0x490   : > { %2072 = vmatpush3.xpose.msra.mxu1 %v1623_v10  ;;  %2073 = vmatprep.mubr.msk.f32.mxu1 %vm2322_vm0, %v2321_v0 }
 0x493   : > { %2074 = vmatmul.mubr.f32.vlgmr.msra.gmra.mxu1 %v2323_v52 }
 0x54f   : > { %v2070_v11 = vpop.f32.mrf.mxu1 }
 0x550   : > { %v1695_v18 = vsub.f32 %v1622_v16, %v2070_v11 }
 0x551   : > { %v1607_v12 = vpop.f32.mrf.mxu1 }
 0x552   : > { %v1694_v19 = vsub.f32 %v1619_v14, %v1607_v12 }
 0x553   : > { %v1690_v13 = vpop.f32.mrf.mxu1 }
 0x554   : > { %v1696_v15 = vmul.f32 0.25, %v1690_v13 }
 0x555   : > { %v2075_v17 = vpop.f32.mrf.mxu1 }
 0x556   : > { %v1700_v20 = vrot.slane %v1696_v15, %v2590_v8 }
 0x558   : > { %v1701_v21 = vadd.f32 %v1700_v20, %v1694_v19  ;;  %v1702_v22 = vadd.f32 %v1700_v20, %v1695_v18 }
 0x55a   : > { %v1703_v23 = vsub.f32 0.0, %v1701_v21  ;;  %v1704_v25 = vsub.f32 0.0, %v1702_v22 }
 0x55c   : > { %1853 = vst.msk [vmem:[%s2596_s22 + $0x30] sm:$0xff] %vm743_vm3, %v1703_v23 }
 0x55d   : > { %1854 = vst.msk [vmem:[%s2596_s22 + $0x38] sm:$0xf] %vm745_vm4, %v1704_v25 }
 0x55e PF: > { %p16_p3 = scmp.ge.s32.totalorder %s2425_s24, 4   ;;  %s2696_s15 = smov %s2303_s16 }
 0x55f   : > { %s2697_s16 = smov %s2307_s17  ;;  %s2698_s17 = smov %s2435_s28 }
 0x560   : > { %s2699_s18 = smov %s2425_s24  ;;  %18 = sbr.rel (!%p16_p3) target bundleno = 5 (0x5), region = 91 }
 0x565   :  { %1732 = vsyncpa [#allocation3], 1 }
 0x566   :  { %1734 = vsyncpa [#allocation3 + $0x1], 1 }
 0x567   :  { %1735 = vsyncpa [#allocation5], 1 }
 0x568   :  { %1736 = vsyncpa [#allocation8], 1 }

</bundles_post_ra>
